<compile_context>
chip_gen: v7x
topology: tpu7x:2x2x1
jax: 0.10.0
libtpu: 0.0.40
codegen_flags: <defaults>
</compile_context>

<pallas_src>
import functools

import jax
import jax.numpy as jnp
from jax import lax
from jax.experimental import pallas as pl
from jax.experimental.pallas import tpu as pltpu


def _round_up(x, m):
    return (x + m - 1) // m * m


# --------------------------------------------------------------------------------------
# Pass 1: per-graph sums of the (uncentered) surrogate model output.
# Output block index is constant across the grid -> resident accumulator (P3 pattern).
# --------------------------------------------------------------------------------------
def _pool_kernel(batch_row_ref,  # [1, tile]   int32  graph id per atom (row layout)
                 feat_ref,       # [tile, F]   bf16   (pos | h | t | 1)
                 w1_ref,         # [F, H]      bf16
                 wout_ref,       # [H, dout]   bf16   cols: equi(3) | inv(Dh)
                 bout_ref,       # [1, dout]   f32
                 pooled_ref):    # [B, dout]   f32    per-graph sums (accumulator)
    B, dout = pooled_ref.shape
    tile = feat_ref.shape[0]

    @pl.when(pl.program_id(0) == 0)
    def _():
        pooled_ref[...] = jnp.zeros_like(pooled_ref)

    # surrogate "PaiNNDiffusion": single fused bf16 matmul + SiLU + bf16 head matmul
    hid = jnp.dot(feat_ref[...], w1_ref[...], preferred_element_type=jnp.float32)
    hid = hid * jax.nn.sigmoid(hid)                                   # SiLU (EUP)
    out = (jnp.dot(hid.astype(jnp.bfloat16), wout_ref[...],
                   preferred_element_type=jnp.float32) + bout_ref[...])

    # one-hot built directly in [B, tile] orientation -> MXU-natural, no XLU transpose
    onehot_bn = (batch_row_ref[...] ==
                 lax.broadcasted_iota(jnp.int32, (B, tile), 0)).astype(jnp.float32)
    pooled_ref[...] += jnp.dot(onehot_bn, out, preferred_element_type=jnp.float32)


# --------------------------------------------------------------------------------------
# Pass 2: recompute the surrogate output per tile and subtract the gathered per-graph
# means (means already masked to the 3 spatial columns in the wrapper). Row axis is
# "parallel" (no cross-tile dependency) -> megacore shardable on v7x.
# --------------------------------------------------------------------------------------
def _center_kernel(batch_col_ref,  # [tile, 1]  int32
                   feat_ref,       # [tile, F]  bf16
                   means_ref,      # [B, dout]  f32  (h-columns already zeroed)
                   w1_ref,         # [F, H]     bf16
                   wout_ref,       # [H, dout]  bf16
                   bout_ref,       # [1, dout]  f32
                   out_ref):       # [tile, dout] f32  cols: eps_pred_x(3) | eps_pred_h(Dh)
    tile = feat_ref.shape[0]
    B = means_ref.shape[0]

    hid = jnp.dot(feat_ref[...], w1_ref[...], preferred_element_type=jnp.float32)
    hid = hid * jax.nn.sigmoid(hid)
    out = (jnp.dot(hid.astype(jnp.bfloat16), wout_ref[...],
                   preferred_element_type=jnp.float32) + bout_ref[...])

    # one-hot in [tile, B] orientation -> MXU-natural gather of per-graph means
    onehot_nb = (batch_col_ref[...] ==
                 lax.broadcasted_iota(jnp.int32, (tile, B), 1)).astype(jnp.float32)
    gathered = jnp.dot(onehot_nb, means_ref[...], preferred_element_type=jnp.float32)
    out_ref[...] = out - gathered          # only eps_x columns change (means masked)


# --------------------------------------------------------------------------------------
# Wrapper
# --------------------------------------------------------------------------------------
def edm_forward(pos, h, t_norm_atom, batch, params, *, num_graphs, tile_rows=512):
    """pos: [N,3] f32, h: [N,Dh] f32, t_norm_atom: [N] f32, batch: [N] int.
    num_graphs must be a static Python int (no host sync). Any batch id >= num_graphs
    is silently ignored by the CoG (contract inherited from global_mean_pool usage)."""
    N = pos.shape[0]
    Dh = h.shape[1]
    B = num_graphs
    w1, wout, bout = params
    F = Dh + 5                     # pos(3) | h(Dh) | t(1) | ones(1)
    H = w1.shape[1]
    dout = Dh + 3

    # ---- single bf16 feature slab: one DMA instead of four lane-padded ones ----
    feat = jnp.concatenate(
        [pos.astype(jnp.float32), h.astype(jnp.float32),
         t_norm_atom.astype(jnp.float32)[:, None],
         jnp.ones((N, 1), jnp.float32)], axis=1).astype(jnp.bfloat16)       # [N, F]

    # ---- row tiling: multiple of 128 (lane-tiled batch_row) and 16 (bf16 sublanes).
    # 512 rows keeps per-tile VMEM tiny on all of v5e/v6e/v7x while amortizing the
    # ~0.35 us per-grid-step overhead. TODO(synk): raise toward 1024-2048 on v6e.
    if N <= tile_rows:
        tile = max(16, _round_up(N, 16))
        n_pad = tile
    else:
        tile = tile_rows
        n_pad = _round_up(N, tile)
    pad = n_pad - N

    batch_i32 = batch.astype(jnp.int32)
    if pad:
        feat = jnp.pad(feat, ((0, pad), (0, 0)))
        # padded rows get graph id B (out of range) -> excluded from pooling & gather
        batch_pad = jnp.concatenate([batch_i32, jnp.full((pad,), B, jnp.int32)])
    else:
        batch_pad = batch_i32
    batch_row = batch_pad[None, :]                                          # [1, n_pad]
    batch_col = batch_pad[:, None]                                          # [n_pad, 1]

    counts = jnp.zeros((B,), jnp.float32).at[batch_i32].add(1.0)
    inv_counts = jnp.where(counts > 0.0, 1.0 / counts, 0.0)                 # zero-safe

    num_tiles = n_pad // tile
    mlp_flops = 2 * n_pad * (F * H + H * dout)
    cog_flops = 2 * n_pad * B * dout
    feat_bytes = n_pad * F * 2
    w_bytes = F * H * 2 + H * dout * 2 + dout * 4

    # ---------------- pass 1: per-graph pooled sums ----------------
    pooled = pl.pallas_call(
        _pool_kernel,
        out_shape=jax.ShapeDtypeStruct((B, dout), jnp.float32),
        grid=(num_tiles,),
        in_specs=[
            pl.BlockSpec((1, tile), lambda j: (0, j)),
            pl.BlockSpec((tile, F), lambda j: (j, 0)),
            pl.BlockSpec((F, H), lambda j: (0, 0)),
            pl.BlockSpec((H, dout), lambda j: (0, 0)),
            pl.BlockSpec((1, dout), lambda j: (0, 0)),
        ],
        out_specs=pl.BlockSpec((B, dout), lambda j: (0, 0)),   # resident accumulator
        compiler_params=pltpu.CompilerParams(dimension_semantics=("arbitrary",)),
        cost_estimate=pl.CostEstimate(
            flops=mlp_flops + cog_flops, transcendentals=n_pad * H,
            bytes_accessed=feat_bytes + w_bytes + n_pad * 4 + B * dout * 4),
    )(batch_row, feat, w1, wout, bout)

    # per-graph means; mask to the 3 spatial columns on the tiny [B, dout] tensor
    means = pooled * inv_counts[:, None]
    means = means * (jnp.arange(dout) < 3).astype(jnp.float32)[None, :]

    # ---------------- pass 2: center eps_x, emit merged output ----------------
    out = pl.pallas_call(
        _center_kernel,
        out_shape=jax.ShapeDtypeStruct((n_pad, dout), jnp.float32),
        grid=(num_tiles,),
        in_specs=[
            pl.BlockSpec((tile, 1), lambda j: (j, 0)),
            pl.BlockSpec((tile, F), lambda j: (j, 0)),
            pl.BlockSpec((B, dout), lambda j: (0, 0)),
            pl.BlockSpec((F, H), lambda j: (0, 0)),
            pl.BlockSpec((H, dout), lambda j: (0, 0)),
            pl.BlockSpec((1, dout), lambda j: (0, 0)),
        ],
        out_specs=pl.BlockSpec((tile, dout), lambda j: (j, 0)),
        compiler_params=pltpu.CompilerParams(dimension_semantics=("parallel",)),
        cost_estimate=pl.CostEstimate(
            flops=mlp_flops + cog_flops, transcendentals=n_pad * H,
            bytes_accessed=feat_bytes + w_bytes + n_pad * 4
            + B * dout * 4 + n_pad * dout * 4),
    )(batch_col, feat, means, w1, wout, bout)

    out = out[:N]
    return out[:, :3], out[:, 3:]   # (eps_pred_x [N,3], eps_pred_h [N,Dh])


def init_params(key, dh, hidden):
    """Surrogate weights: bf16 packed matrices, input bias folded via the ones column."""
    k1, k2, k3, k4, k5 = jax.random.split(key, 5)
    din = 3 + dh + 1                                        # pos | h | t
    w1 = jax.random.normal(k1, (din, hidden), jnp.float32) / jnp.sqrt(din)
    b1 = 0.02 * jax.random.normal(k4, (1, hidden), jnp.float32)
    w1_aug = jnp.concatenate([w1, b1], axis=0).astype(jnp.bfloat16)     # [din+1, H]
    we = jax.random.normal(k2, (hidden, 3), jnp.float32) / jnp.sqrt(hidden)
    wi = jax.random.normal(k3, (hidden, dh), jnp.float32) / jnp.sqrt(hidden)
    w_out = jnp.concatenate([we, wi], axis=1).astype(jnp.bfloat16)      # [H, 3+dh]
    b_out = 0.02 * jax.random.normal(k5, (1, 3 + dh), jnp.float32)      # f32 (post-acc)
    return (w1_aug, w_out, b_out)


def _reference_forward(pos, h, t, batch, params, num_graphs):
    """Pure-JAX reference of the same surrogate forward + EDM eps head."""
    w1, wout, bout = params
    N = pos.shape[0]
    feat = jnp.concatenate([pos, h, t[:, None], jnp.ones((N, 1), jnp.float32)],
                           axis=1).astype(jnp.bfloat16)
    hid = jnp.dot(feat, w1, preferred_element_type=jnp.float32)
    hid = hid * jax.nn.sigmoid(hid)
    out = jnp.dot(hid.astype(jnp.bfloat16), wout,
                  preferred_element_type=jnp.float32) + bout
    onehot = jax.nn.one_hot(batch, num_graphs, dtype=jnp.float32)
    counts = jnp.maximum(jnp.sum(onehot, axis=0), 1.0)
    means_x = (onehot.T @ out[:, :3]) / counts[:, None]
    return out[:, :3] - onehot @ means_x, out[:, 3:]


if __name__ == "__main__":
    key = jax.random.PRNGKey(0)
    k_pos, k_h, k_t, k_param = jax.random.split(key, 4)

    # small synthetic graph batch: 2 graphs, 8 atoms each
    B = 2
    N = 16
    Dh = 8          # atom feature dim
    HIDDEN = 128    # surrogate hidden width (128-multiple for MXU column utilization)

    pos = jax.random.normal(k_pos, (N, 3), jnp.float32)
    h = jax.random.normal(k_h, (N, Dh), jnp.float32)
    batch = jnp.repeat(jnp.arange(B, dtype=jnp.int32), N // B)     # [N]
    t_norm_graph = jax.random.uniform(k_t, (B,), jnp.float32)      # t / T per graph
    t_norm_atom = t_norm_graph[batch]                              # per-atom t_norm

    params = init_params(k_param, Dh, HIDDEN)

    fwd = jax.jit(functools.partial(edm_forward, num_graphs=B))
    eps_pred_x, eps_pred_h = fwd(pos, h, t_norm_atom, batch, params)
    jax.block_until_ready((eps_pred_x, eps_pred_h))

    assert eps_pred_x.shape == (N, 3)
    assert eps_pred_h.shape == (N, Dh)

    # sanity 1: per-graph center of geometry of eps_pred_x must be ~0 (f32 centering)
    onehot = jax.nn.one_hot(batch, B, dtype=jnp.float32)
    cog = onehot.T @ eps_pred_x / jnp.sum(onehot, axis=0)[:, None]
    assert float(jnp.max(jnp.abs(cog))) < 1e-4

    # sanity 2: matches the pure-JAX reference of the same surrogate math
    ref_x, ref_h = _reference_forward(pos, h, t_norm_atom, batch, params, B)
    assert float(jnp.max(jnp.abs(eps_pred_x - ref_x))) < 1e-2
    assert float(jnp.max(jnp.abs(eps_pred_h - ref_h))) < 1e-2

    print("KERNEL_OK")
</pallas_src>

<mosaic_0001>
module attributes {stable_mosaic.version = 11 : i64} {
  func.func private @main(%arg0: i32) attributes {dimension_semantics = [#tpu.dimension_semantics<core_parallel>], iteration_bounds = array<i64: 2>, tpu.core_type = #tpu.core_type<sc_scalar_subcore>, window_params = []} {
    return
  }
}

module attributes {stable_mosaic.version = 11 : i64} {
  func.func private @main(%arg0: i32) attributes {dimension_semantics = [#tpu.dimension_semantics<core_parallel>], iteration_bounds = array<i64: 2>, tpu.core_type = #tpu.core_type<sc_scalar_subcore>, window_params = []} {
    return
  }
}

module attributes {stable_mosaic.version = 11 : i64} {
  func.func @_pool_kernel(%arg0: i32, %arg1: memref<1x16xi32, #tpu.memory_space<vmem>>, %arg2: memref<16x13xbf16, #tpu.memory_space<vmem>>, %arg3: memref<13x128xbf16, #tpu.memory_space<vmem>>, %arg4: memref<128x11xbf16, #tpu.memory_space<vmem>>, %arg5: memref<1x11xf32, #tpu.memory_space<vmem>>, %arg6: memref<2x11xf32, #tpu.memory_space<vmem>>) attributes {dimension_semantics = [#tpu.dimension_semantics<arbitrary>], iteration_bounds = array<i64: 1>, scalar_prefetch = 0 : i64, scratch_operands = 0 : i64, tpu.core_type = #tpu.core_type<tc>, window_params = [{transform_indices = @transform_0, window_bounds = array<i64: 1, 16>}, {transform_indices = @transform_1, window_bounds = array<i64: 16, 13>}, {pipeline_mode = #tpu.pipeline_mode<synchronous>, transform_indices = @transform_2, window_bounds = array<i64: 13, 128>}, {pipeline_mode = #tpu.pipeline_mode<synchronous>, transform_indices = @transform_3, window_bounds = array<i64: 128, 11>}, {pipeline_mode = #tpu.pipeline_mode<synchronous>, transform_indices = @transform_4, window_bounds = array<i64: 1, 11>}, {pipeline_mode = #tpu.pipeline_mode<synchronous>, transform_indices = @transform_5, window_bounds = array<i64: 2, 11>}]} {
    %c0_i32 = arith.constant 0 : i32
    %0 = arith.cmpi eq, %arg0, %c0_i32 : i32
    %1 = arith.extui %0 : i1 to i32
    %c0_i32_0 = arith.constant 0 : i32
    %2 = arith.cmpi ne, %1, %c0_i32_0 : i32
    scf.if %2 {
      %cst_17 = arith.constant 0.000000e+00 : f32
      %28 = vector.broadcast %cst_17 : f32 to vector<2x11xf32>
      %c0_18 = arith.constant 0 : index
      %c0_19 = arith.constant 0 : index
      %29 = vector.load %arg6[%c0_18, %c0_19] : memref<2x11xf32, #tpu.memory_space<vmem>>, vector<2x11xf32>
      tpu.vector_store %arg6[%c0_18, %c0_19], %28 {strides = array<i32>} : memref<2x11xf32, #tpu.memory_space<vmem>>, vector<2x11xf32>,
    } else {
    }
    %c0 = arith.constant 0 : index
    %c0_1 = arith.constant 0 : index
    %3 = vector.load %arg2[%c0, %c0_1] : memref<16x13xbf16, #tpu.memory_space<vmem>>, vector<16x13xbf16>
    %c0_2 = arith.constant 0 : index
    %c0_3 = arith.constant 0 : index
    %4 = vector.load %arg3[%c0_2, %c0_3] : memref<13x128xbf16, #tpu.memory_space<vmem>>, vector<13x128xbf16>
    %cst = arith.constant dense<0.000000e+00> : vector<16x128xf32>
    %5 = tpu.matmul %3, %4, %cst {dimension_numbers = #tpu.dot_dimension_numbers<[1], [0], [0], [1], [0, 0, 1, 1], [], []>} : vector<16x13xbf16>, vector<13x128xbf16>, vector<16x128xf32> -> vector<16x128xf32>
    %6 = arith.negf %5 : vector<16x128xf32>
    %7 = math.exp %6 : vector<16x128xf32>
    %cst_4 = arith.constant 1.000000e+00 : f32
    %8 = vector.broadcast %cst_4 : f32 to vector<16x128xf32>
    %9 = arith.addf %8, %7 : vector<16x128xf32>
    %10 = arith.divf %8, %9 : vector<16x128xf32>
    %11 = arith.mulf %5, %10 : vector<16x128xf32>
    %12 = arith.truncf %11 : vector<16x128xf32> to vector<16x128xbf16>
    %c0_5 = arith.constant 0 : index
    %c0_6 = arith.constant 0 : index
    %13 = vector.load %arg4[%c0_5, %c0_6] : memref<128x11xbf16, #tpu.memory_space<vmem>>, vector<128x11xbf16>
    %cst_7 = arith.constant dense<0.000000e+00> : vector<16x11xf32>
    %14 = tpu.matmul %12, %13, %cst_7 {dimension_numbers = #tpu.dot_dimension_numbers<[1], [0], [0], [1], [0, 0, 1, 1], [], []>} : vector<16x128xbf16>, vector<128x11xbf16>, vector<16x11xf32> -> vector<16x11xf32>
    %c0_8 = arith.constant 0 : index
    %c0_9 = arith.constant 0 : index
    %15 = vector.load %arg5[%c0_8, %c0_9] : memref<1x11xf32, #tpu.memory_space<vmem>>, vector<1x11xf32>
    %16 = vector.broadcast %15 : vector<1x11xf32> to vector<16x11xf32>
    %17 = arith.addf %14, %16 : vector<16x11xf32>
    %c0_10 = arith.constant 0 : index
    %c0_11 = arith.constant 0 : index
    %18 = vector.load %arg1[%c0_10, %c0_11] : memref<1x16xi32, #tpu.memory_space<vmem>>, vector<1x16xi32>
    %19 = tpu.iota {dimensions = array<i32: 0>} : vector<2x16xi32>
    %20 = vector.broadcast %18 : vector<1x16xi32> to vector<2x16xi32>
    %21 = arith.cmpi eq, %20, %19 : vector<2x16xi32>
    %22 = arith.extui %21 : vector<2x16xi1> to vector<2x16xi32>
    %23 = arith.sitofp %22 : vector<2x16xi32> to vector<2x16xf32>
    %c0_12 = arith.constant 0 : index
    %c0_13 = arith.constant 0 : index
    %24 = vector.load %arg6[%c0_12, %c0_13] : memref<2x11xf32, #tpu.memory_space<vmem>>, vector<2x11xf32>
    %cst_14 = arith.constant dense<0.000000e+00> : vector<2x11xf32>
    %25 = tpu.matmul %23, %17, %cst_14 {dimension_numbers = #tpu.dot_dimension_numbers<[1], [0], [0], [1], [0, 0, 1, 1], [], []>} : vector<2x16xf32>, vector<16x11xf32>, vector<2x11xf32> -> vector<2x11xf32>
    %26 = arith.addf %24, %25 : vector<2x11xf32>
    %c0_15 = arith.constant 0 : index
    %c0_16 = arith.constant 0 : index
    %27 = vector.load %arg6[%c0_15, %c0_16] : memref<2x11xf32, #tpu.memory_space<vmem>>, vector<2x11xf32>
    tpu.vector_store %arg6[%c0_15, %c0_16], %26 {strides = array<i32>} : memref<2x11xf32, #tpu.memory_space<vmem>>, vector<2x11xf32>,
    return
  }
  func.func @transform_0(%arg0: i32) -> (i32, i32) {
    %c0_i32 = arith.constant 0 : i32
    %c0_i32_0 = arith.constant 0 : i32
    return %c0_i32, %arg0 : i32, i32
  }
  func.func @transform_1(%arg0: i32) -> (i32, i32) {
    %c0_i32 = arith.constant 0 : i32
    %c0_i32_0 = arith.constant 0 : i32
    return %arg0, %c0_i32 : i32, i32
  }
  func.func @transform_2(%arg0: i32) -> (i32, i32) {
    %c0_i32 = arith.constant 0 : i32
    %c0_i32_0 = arith.constant 0 : i32
    %c0_i32_1 = arith.constant 0 : i32
    return %c0_i32, %c0_i32_0 : i32, i32
  }
  func.func @transform_3(%arg0: i32) -> (i32, i32) {
    %c0_i32 = arith.constant 0 : i32
    %c0_i32_0 = arith.constant 0 : i32
    %c0_i32_1 = arith.constant 0 : i32
    return %c0_i32, %c0_i32_0 : i32, i32
  }
  func.func @transform_4(%arg0: i32) -> (i32, i32) {
    %c0_i32 = arith.constant 0 : i32
    %c0_i32_0 = arith.constant 0 : i32
    %c0_i32_1 = arith.constant 0 : i32
    return %c0_i32, %c0_i32_0 : i32, i32
  }
  func.func @transform_5(%arg0: i32) -> (i32, i32) {
    %c0_i32 = arith.constant 0 : i32
    %c0_i32_0 = arith.constant 0 : i32
    %c0_i32_1 = arith.constant 0 : i32
    return %c0_i32, %c0_i32_0 : i32, i32
  }
}

module attributes {stable_mosaic.version = 11 : i64} {
  func.func @_center_kernel(%arg0: i32, %arg1: memref<16x1xi32, #tpu.memory_space<vmem>>, %arg2: memref<16x13xbf16, #tpu.memory_space<vmem>>, %arg3: memref<2x11xf32, #tpu.memory_space<vmem>>, %arg4: memref<13x128xbf16, #tpu.memory_space<vmem>>, %arg5: memref<128x11xbf16, #tpu.memory_space<vmem>>, %arg6: memref<1x11xf32, #tpu.memory_space<vmem>>, %arg7: memref<16x11xf32, #tpu.memory_space<vmem>>) attributes {dimension_semantics = [#tpu.dimension_semantics<parallel>], iteration_bounds = array<i64: 1>, scalar_prefetch = 0 : i64, scratch_operands = 0 : i64, tpu.core_type = #tpu.core_type<tc>, window_params = [{transform_indices = @transform_0, window_bounds = array<i64: 16, 1>}, {transform_indices = @transform_1, window_bounds = array<i64: 16, 13>}, {pipeline_mode = #tpu.pipeline_mode<synchronous>, transform_indices = @transform_2, window_bounds = array<i64: 2, 11>}, {pipeline_mode = #tpu.pipeline_mode<synchronous>, transform_indices = @transform_3, window_bounds = array<i64: 13, 128>}, {pipeline_mode = #tpu.pipeline_mode<synchronous>, transform_indices = @transform_4, window_bounds = array<i64: 128, 11>}, {pipeline_mode = #tpu.pipeline_mode<synchronous>, transform_indices = @transform_5, window_bounds = array<i64: 1, 11>}, {transform_indices = @transform_6, window_bounds = array<i64: 16, 11>}]} {
    %c0 = arith.constant 0 : index
    %c0_0 = arith.constant 0 : index
    %0 = vector.load %arg2[%c0, %c0_0] : memref<16x13xbf16, #tpu.memory_space<vmem>>, vector<16x13xbf16>
    %c0_1 = arith.constant 0 : index
    %c0_2 = arith.constant 0 : index
    %1 = vector.load %arg4[%c0_1, %c0_2] : memref<13x128xbf16, #tpu.memory_space<vmem>>, vector<13x128xbf16>
    %cst = arith.constant dense<0.000000e+00> : vector<16x128xf32>
    %2 = tpu.matmul %0, %1, %cst {dimension_numbers = #tpu.dot_dimension_numbers<[1], [0], [0], [1], [0, 0, 1, 1], [], []>} : vector<16x13xbf16>, vector<13x128xbf16>, vector<16x128xf32> -> vector<16x128xf32>
    %3 = arith.negf %2 : vector<16x128xf32>
    %4 = math.exp %3 : vector<16x128xf32>
    %cst_3 = arith.constant 1.000000e+00 : f32
    %5 = vector.broadcast %cst_3 : f32 to vector<16x128xf32>
    %6 = arith.addf %5, %4 : vector<16x128xf32>
    %7 = arith.divf %5, %6 : vector<16x128xf32>
    %8 = arith.mulf %2, %7 : vector<16x128xf32>
    %9 = arith.truncf %8 : vector<16x128xf32> to vector<16x128xbf16>
    %c0_4 = arith.constant 0 : index
    %c0_5 = arith.constant 0 : index
    %10 = vector.load %arg5[%c0_4, %c0_5] : memref<128x11xbf16, #tpu.memory_space<vmem>>, vector<128x11xbf16>
    %cst_6 = arith.constant dense<0.000000e+00> : vector<16x11xf32>
    %11 = tpu.matmul %9, %10, %cst_6 {dimension_numbers = #tpu.dot_dimension_numbers<[1], [0], [0], [1], [0, 0, 1, 1], [], []>} : vector<16x128xbf16>, vector<128x11xbf16>, vector<16x11xf32> -> vector<16x11xf32>
    %c0_7 = arith.constant 0 : index
    %c0_8 = arith.constant 0 : index
    %12 = vector.load %arg6[%c0_7, %c0_8] : memref<1x11xf32, #tpu.memory_space<vmem>>, vector<1x11xf32>
    %13 = vector.broadcast %12 : vector<1x11xf32> to vector<16x11xf32>
    %14 = arith.addf %11, %13 : vector<16x11xf32>
    %c0_9 = arith.constant 0 : index
    %c0_10 = arith.constant 0 : index
    %15 = vector.load %arg1[%c0_9, %c0_10] : memref<16x1xi32, #tpu.memory_space<vmem>>, vector<16x1xi32>
    %16 = tpu.iota {dimensions = array<i32: 1>} : vector<16x2xi32>
    %17 = vector.broadcast %15 : vector<16x1xi32> to vector<16x2xi32>
    %18 = arith.cmpi eq, %17, %16 : vector<16x2xi32>
    %19 = arith.extui %18 : vector<16x2xi1> to vector<16x2xi32>
    %20 = arith.sitofp %19 : vector<16x2xi32> to vector<16x2xf32>
    %c0_11 = arith.constant 0 : index
    %c0_12 = arith.constant 0 : index
    %21 = vector.load %arg3[%c0_11, %c0_12] : memref<2x11xf32, #tpu.memory_space<vmem>>, vector<2x11xf32>
    %cst_13 = arith.constant dense<0.000000e+00> : vector<16x11xf32>
    %22 = tpu.matmul %20, %21, %cst_13 {dimension_numbers = #tpu.dot_dimension_numbers<[1], [0], [0], [1], [0, 0, 1, 1], [], []>} : vector<16x2xf32>, vector<2x11xf32>, vector<16x11xf32> -> vector<16x11xf32>
    %23 = arith.subf %14, %22 : vector<16x11xf32>
    %c0_14 = arith.constant 0 : index
    %c0_15 = arith.constant 0 : index
    %24 = vector.load %arg7[%c0_14, %c0_15] : memref<16x11xf32, #tpu.memory_space<vmem>>, vector<16x11xf32>
    tpu.vector_store %arg7[%c0_14, %c0_15], %23 {strides = array<i32>} : memref<16x11xf32, #tpu.memory_space<vmem>>, vector<16x11xf32>,
    return
  }
  func.func @transform_0(%arg0: i32) -> (i32, i32) {
    %c0_i32 = arith.constant 0 : i32
    %c0_i32_0 = arith.constant 0 : i32
    return %arg0, %c0_i32 : i32, i32
  }
  func.func @transform_1(%arg0: i32) -> (i32, i32) {
    %c0_i32 = arith.constant 0 : i32
    %c0_i32_0 = arith.constant 0 : i32
    return %arg0, %c0_i32 : i32, i32
  }
  func.func @transform_2(%arg0: i32) -> (i32, i32) {
    %c0_i32 = arith.constant 0 : i32
    %c0_i32_0 = arith.constant 0 : i32
    %c0_i32_1 = arith.constant 0 : i32
    return %c0_i32, %c0_i32_0 : i32, i32
  }
  func.func @transform_3(%arg0: i32) -> (i32, i32) {
    %c0_i32 = arith.constant 0 : i32
    %c0_i32_0 = arith.constant 0 : i32
    %c0_i32_1 = arith.constant 0 : i32
    return %c0_i32, %c0_i32_0 : i32, i32
  }
  func.func @transform_4(%arg0: i32) -> (i32, i32) {
    %c0_i32 = arith.constant 0 : i32
    %c0_i32_0 = arith.constant 0 : i32
    %c0_i32_1 = arith.constant 0 : i32
    return %c0_i32, %c0_i32_0 : i32, i32
  }
  func.func @transform_5(%arg0: i32) -> (i32, i32) {
    %c0_i32 = arith.constant 0 : i32
    %c0_i32_0 = arith.constant 0 : i32
    %c0_i32_1 = arith.constant 0 : i32
    return %c0_i32, %c0_i32_0 : i32, i32
  }
  func.func @transform_6(%arg0: i32) -> (i32, i32) {
    %c0_i32 = arith.constant 0 : i32
    %c0_i32_0 = arith.constant 0 : i32
    return %arg0, %c0_i32 : i32, i32
  }
}

</mosaic_0001>

<bundles_post_ra>
// kernel: edm_forward.2
= control target key start
LH: loop header
LB: loop body
LE: loop exit
PB: predicated region body
PF: predicated region fallthrough
CT: control target
= control target key end

     0   :  { %vm45_vm0 = vcmask 1045504   ;;  %vm46_vm1 = vcmask 1046528   ;;  %v401_v0 = vmov 0.0   ;;  %v402_v2 = vmov 65535   ;;  %s496_s2 = inlined_call_operand.vmem [shape: bf16[13,128], index: 2, kind: input, shape index: {}]   ;;  %s497_s1 = inlined_call_operand.vmem [shape: bf16[16,13], index: 1, kind: input, shape index: {}]   ;;  %s498_s3 = inlined_call_operand.vmem [shape: bf16[128,11], index: 3, kind: input, shape index: {}]   ;;  %s499_s5 = inlined_call_operand.vmem [shape: f32[2,11], index: 5, kind: output, shape index: {}]   ;;  %s500_s4 = inlined_call_operand.vmem [shape: f32[1,11], index: 4, kind: input, shape index: {}]   ;;  %s501_s0 = inlined_call_operand.vmem [shape: s32[1,16], index: 0, kind: input, shape index: {}]  }
   0x1   :  { %343 = vmatprep.subr.bf16.mxu0 %v401_v0  ;;  %v383_v1 = vld [vmem:[%s496_s2] sm:$0x7f]   ;;  %349 = vmatprep.subr.bf16.mxu1 %v401_v0  ;;  %v47_v3 = vsel %vm45_vm0, 4294967295, %v402_v2  ;;  %vm403_vm2 = vmmov 0   ;;  %vm41_vm3 = vcmask 105472   ;;  %v386_v8 = vld [vmem:[%s498_s3 + $0x8] sm:$0xff]   ;;  %v221_v31 = vlaneseq }
   0x2   :  { %v48_v4 = vsel %vm46_vm1, %v47_v3, 0  ;;  %345 = vmatprep.mubr.msk.bf16.mxu0 %vm403_vm2, %v401_v0  ;;  %365 = vmatprep.mubr.msk.bf16.mxu1 %vm403_vm2, %v401_v0  ;;  %v384_v6 = vld [vmem:[%s497_s1] sm:$0xff]   ;;  %v387_v9 = vld [vmem:[%s498_s3 + $0x10] sm:$0xff]   ;;  %v388_v10 = vld [vmem:[%s498_s3 + $0x18] sm:$0xff]   ;;  %v404_v30 = vmov 0.0|0.0   ;;  %vm25_vm4 = vcmask 82944  }
   0x3   :  { %v50_v5 = vand.u32 %v383_v1, %v48_v4  ;;  %v385_v7 = vld [vmem:[%s498_s3] sm:$0xff]   ;;  %v390_v12 = vld [vmem:[%s498_s3 + $0x28] sm:$0xff]   ;;  %v391_v13 = vld [vmem:[%s498_s3 + $0x30] sm:$0xff]   ;;  %26 = vst.msk [vmem:[%s499_s5] sm:$0x3] %vm25_vm4, %v401_v0  ;;  %v222_v34 = vshrl.u32 %v221_v31, 7 }
   0x4   :  { %350 = vmatpush3.bf16.msra.mxu1 %v385_v7  ;;  %v389_v11 = vld [vmem:[%s498_s3 + $0x20] sm:$0xff]   ;;  %v392_v14 = vld [vmem:[%s498_s3 + $0x38] sm:$0xff]   ;;  %vm231_vm6 = vcmask 130048  }
   0x5   :  { %344 = vmatpush3.bf16.msra.mxu0 %v50_v5  ;;  %351 = vmatprep.subr.bf16.mxu1 %v401_v0  ;;  %v317_v32 = vld [vmem:[%s500_s4] ss:$0 sm:$0xff] }
   0x6   :  { %376 = vmatprep.subr.bf16.mxu0 %v404_v30  ;;  %v326_v36 = vld [vmem:[%s501_s0] ss:$0 sm:$0xff] }
   0x7   :  { %vm227_vm5 = vcmp.eq.s32.totalorder %v326_v36, %v222_v34 }
   0x8   :  { %346 = vmatmul.mubr.msk.bf16.vlgmr.msra.gmra.mrb[0].mxu0 %vm41_vm3, %v384_v6  ;;  %352 = vmatpush3.bf16.msra.mxu1 %v386_v8  ;;  %v327_v42 = vsel %vm227_vm5, 1.0, %v401_v0 }
   0x9   :  { %373 = vmatprep.mubr.msk.f32.mxu0 %vm403_vm2, %v401_v0  ;;  %353 = vmatprep.subr.bf16.mxu1 %v401_v0 }
   0xa   :  { %v230_v43 = vld [vmem:[%s499_s5] sm:$0x3] }
   0xc   :  { %354 = vmatpush3.bf16.msra.mxu1 %v387_v9 }
   0xd   :  { %355 = vmatprep.subr.bf16.mxu1 %v401_v0 }
  0x10   :  { %356 = vmatpush3.bf16.msra.mxu1 %v388_v10 }
  0x11   :  { %357 = vmatprep.subr.bf16.mxu1 %v401_v0 }
  0x14   :  { %358 = vmatpush3.bf16.msra.mxu1 %v389_v11 }
  0x15   :  { %359 = vmatprep.subr.bf16.mxu1 %v401_v0 }
  0x18   :  { %360 = vmatpush3.bf16.msra.mxu1 %v390_v12 }
  0x19   :  { %361 = vmatprep.subr.bf16.mxu1 %v401_v0 }
  0x1c   :  { %362 = vmatpush3.bf16.msra.mxu1 %v391_v13 }
  0x1d   :  { %363 = vmatprep.subr.bf16.mxu1 %v401_v0 }
  0x20   :  { %364 = vmatpush3.bf16.msra.mxu1 %v392_v14 }
  0xdb   :  { %v86_v15 = vpop.f32.mrb[0].mxu0 }
  0xdc   :  { %v315_v16 = vmul.f32 -1.442695, %v86_v15  ;;  %v347_v17 = vpop.f32.mrb[1].mxu0 }
  0xdd   :  { %v89_v18 = vpop.f32.mrb[2].mxu0 }
  0xde   :  { %393 = vpow2.f32 %v315_v16  ;;  %v316_v19 = vmul.f32 -1.442695, %v89_v18  ;;  %v348_v20 = vpop.f32.mrb[3].mxu0 }
  0xe0   :  { %395 = vpow2.f32 %v316_v19 }
  0xe8   :  { %v394_v21 = vpop.eup %393 }
  0xe9   :  { %v99_v22 = vadd.f32 1.0, %v394_v21 }
  0xea   :  { %v396_v23 = vpop.eup %395 }
  0xeb   :  { %397 = vrcp.f32 %v99_v22  ;;  %v100_v24 = vadd.f32 1.0, %v396_v23 }
  0xed   :  { %399 = vrcp.f32 %v100_v24 }
  0xf5   :  { %v398_v25 = vpop.eup %397 }
  0xf6   :  { %v105_v27 = vmul.f32 %v398_v25, %v86_v15 }
  0xf7   :  { %v400_v26 = vpop.eup %399 }
  0xf8   :  { %v106_v28 = vmul.f32 %v400_v26, %v89_v18 }
  0xfa   :  { %v107_v29 = vpack.c.bf16 %v106_v28, %v105_v27 }
  0xfc   :  { %366 = vmatmul.mubr.bf16.vlgmr.msra.gmra.mrb[0].mxu1 %v107_v29 }
 0x1cf   :  { %v213_v33 = vpop.f32.mrb[0].mxu1 }
 0x1d0   :  { %v367_v35 = vpop.f32.mrb[1].mxu1  ;;  %v214_v38 = vadd.f32 %v317_v32, %v213_v33 }
 0x1d1   :  { %v216_v37 = vpop.f32.mrb[2].mxu1 }
 0x1d2   :  { %v217_v39 = vadd.f32 %v317_v32, %v216_v37  ;;  %v368_v40 = vpop.f32.mrb[3].mxu1 }
 0x1d4   :  { %v377_v41 = vpack.c.bf16 %v217_v39, %v214_v38 }
 0x1d6   :  { %378 = vmatpush3.bf16.msra.mxu0 %v377_v41 }
 0x1d9   :  { %374 = vmatmul.mubr.msk.f32.vlgmr.msra.gmra.mrb[4].mxu0 %vm231_vm6, %v327_v42 }
 0x2ac   :  { %v301_v44 = vpop.f32.mrb[4].mxu0 }
 0x2ad   :  { %v305_v45 = vadd.f32 %v301_v44, %v230_v43  ;;  %v375_v46 = vpop.f32.mrb[5].mxu0 }
 0x2af   :  { %307 = vst.msk [vmem:[%s499_s5] sm:$0x3] %vm25_vm4, %v305_v45 }

// kernel: edm_forward.3
= control target key start
LH: loop header
LB: loop body
LE: loop exit
PB: predicated region body
PF: predicated region fallthrough
CT: control target
= control target key end

     0   :  { %vm42_vm0 = vcmask 1045504   ;;  %vm43_vm1 = vcmask 1046528   ;;  %v416_v0 = vmov 0.0   ;;  %v417_v2 = vmov 65535   ;;  %s503_s3 = inlined_call_operand.vmem [shape: bf16[13,128], index: 3, kind: input, shape index: {}]   ;;  %s504_s0 = inlined_call_operand.vmem [shape: s32[16,1], index: 0, kind: input, shape index: {}]   ;;  %s505_s1 = inlined_call_operand.vmem [shape: bf16[16,13], index: 1, kind: input, shape index: {}]   ;;  %s506_s4 = inlined_call_operand.vmem [shape: bf16[128,11], index: 4, kind: input, shape index: {}]   ;;  %s507_s2 = inlined_call_operand.vmem [shape: f32[2,11], index: 2, kind: input, shape index: {}]   ;;  %s508_s5 = inlined_call_operand.vmem [shape: f32[1,11], index: 5, kind: input, shape index: {}]   ;;  %s509_s6 = inlined_call_operand.vmem [shape: f32[16,11], index: 6, kind: output, shape index: {}]  }
   0x1   :  { %362 = vmatprep.subr.bf16.mxu0 %v416_v0  ;;  %v398_v1 = vld [vmem:[%s503_s3] sm:$0x7f]   ;;  %368 = vmatprep.subr.bf16.mxu1 %v416_v0  ;;  %v44_v3 = vsel %vm42_vm0, 4294967295, %v417_v2  ;;  %vm418_vm2 = vmmov 0   ;;  %v419_v7 = vmov 0   ;;  %vm38_vm3 = vcmask 105472  }
   0x2   :  { %v45_v4 = vsel %vm43_vm1, %v44_v3, 0  ;;  %364 = vmatprep.mubr.msk.bf16.mxu0 %vm418_vm2, %v416_v0  ;;  %v217_v5 = vld [vmem:[%s504_s0] sm:$0xff]  ;;  %384 = vmatprep.mubr.msk.bf16.mxu1 %vm418_vm2, %v416_v0  ;;  %v218_v9 = vld [vmem:[%s504_s0 + $0x8] sm:$0xff]  ;;  %v402_v12 = vld [vmem:[%s506_s4 + $0x10] sm:$0xff]   ;;  %vm241_vm4 = vcmask 1041408   ;;  %v219_v19 = vlaneseq  ;;  %vm234_vm5 = vcmask 15360  }
   0x3   :  { %v47_v6 = vand.u32 %v398_v1, %v45_v4  ;;  %397 = vset.pattern.permute.xlu0 %v419_v7  ;;  %v399_v8 = vld [vmem:[%s505_s1] sm:$0xff]   ;;  %v401_v11 = vld [vmem:[%s506_s4 + $0x8] sm:$0xff]   ;;  %v403_v13 = vld [vmem:[%s506_s4 + $0x18] sm:$0xff]   ;;  %vm322_vm8 = vcmask 89088  }
   0x4   :  { %222 = vperm.xlu0 %397, %v217_v5   ;;  %v400_v10 = vld [vmem:[%s506_s4] sm:$0xff]   ;;  %v405_v15 = vld [vmem:[%s506_s4 + $0x28] sm:$0xff]   ;;  %v406_v16 = vld [vmem:[%s506_s4 + $0x30] sm:$0xff]   ;;  %v220_v20 = vand.u32 127, %v219_v19 }
   0x5   :  { %363 = vmatpush3.bf16.msra.mxu0 %v47_v6  ;;  %369 = vmatpush3.bf16.msra.mxu1 %v400_v10  ;;  %v404_v14 = vld [vmem:[%s506_s4 + $0x20] sm:$0xff]   ;;  %v407_v18 = vld [vmem:[%s506_s4 + $0x38] sm:$0xff]  }
   0x6   :  { %370 = vmatprep.subr.bf16.mxu1 %v416_v0  ;;  %v233_v17 = vld [vmem:[%s507_s2] sm:$0x3] }
   0x7   :  { %388 = vmatprep.subr.msk.mxu0 %vm241_vm4, %v233_v17  ;;  %v334_v42 = vld [vmem:[%s508_s5] ss:$0 sm:$0xff] }
   0x8   :  { %365 = vmatmul.mubr.msk.bf16.vlgmr.msra.gmra.mrb[0].mxu0 %vm38_vm3, %v399_v8  ;;  %225 = vperm.xlu0 %397, %v218_v9  }
   0x9   :  { %371 = vmatpush3.bf16.msra.mxu1 %v401_v11  ;;  %389 = vmatpush3.msk.msra.mxu0 %vm241_vm4, %v233_v17 }
   0xa   :  { %372 = vmatprep.subr.bf16.mxu1 %v416_v0 }
   0xd   :  { %373 = vmatpush3.bf16.msra.mxu1 %v402_v12 }
   0xe   :  { %374 = vmatprep.subr.bf16.mxu1 %v416_v0 }
  0x11   :  { %375 = vmatpush3.bf16.msra.mxu1 %v403_v13 }
  0x12   :  { %376 = vmatprep.subr.bf16.mxu1 %v416_v0 }
  0x15   :  { %377 = vmatpush3.bf16.msra.mxu1 %v404_v14 }
  0x16   :  { %378 = vmatprep.subr.bf16.mxu1 %v416_v0 }
  0x19   :  { %379 = vmatpush3.bf16.msra.mxu1 %v405_v15 }
  0x1a   :  { %380 = vmatprep.subr.bf16.mxu1 %v416_v0 }
  0x1d   :  { %381 = vmatpush3.bf16.msra.mxu1 %v406_v16 }
  0x1e   :  { %382 = vmatprep.subr.bf16.mxu1 %v416_v0 }
  0x21   :  { %383 = vmatpush3.bf16.msra.mxu1 %v407_v18 }
  0x83   :  { %v223_v21 = vpop.permute.xlu0 %222 }
  0x84   :  { %vm227_vm6 = vcmp.eq.s32.totalorder %v223_v21, %v220_v20 }
  0x85   :  { %v343_v22 = vsel %vm227_vm6, 1.0, %v416_v0 }
  0x86   :  { %390 = vmatprep.mubr.msk.f32.mxu0 %vm234_vm5, %v343_v22 }
  0x87   :  { %v226_v23 = vpop.permute.xlu0 %225 }
  0x88   :  { %vm228_vm7 = vcmp.eq.s32.totalorder %v226_v23, %v220_v20 }
  0x89   :  { %v344_v24 = vsel %vm228_vm7, 1.0, %v416_v0 }
  0x8a   :  { %391 = vmatmul.mubr.msk.f32.vlgmr.msra.gmra.mrb[4].mxu0 %vm234_vm5, %v344_v24 }
  0xdb   :  { %v83_v25 = vpop.f32.mrb[0].mxu0 }
  0xdc   :  { %v332_v26 = vmul.f32 -1.442695, %v83_v25  ;;  %v366_v27 = vpop.f32.mrb[1].mxu0 }
  0xdd   :  { %v86_v28 = vpop.f32.mrb[2].mxu0 }
  0xde   :  { %408 = vpow2.f32 %v332_v26  ;;  %v333_v29 = vmul.f32 -1.442695, %v86_v28  ;;  %v367_v30 = vpop.f32.mrb[3].mxu0 }
  0xe0   :  { %410 = vpow2.f32 %v333_v29 }
  0xe8   :  { %v409_v31 = vpop.eup %408 }
  0xe9   :  { %v96_v32 = vadd.f32 1.0, %v409_v31 }
  0xea   :  { %v411_v33 = vpop.eup %410 }
  0xeb   :  { %412 = vrcp.f32 %v96_v32  ;;  %v97_v34 = vadd.f32 1.0, %v411_v33 }
  0xed   :  { %414 = vrcp.f32 %v97_v34 }
  0xf5   :  { %v413_v35 = vpop.eup %412 }
  0xf6   :  { %v102_v37 = vmul.f32 %v413_v35, %v83_v25 }
  0xf7   :  { %v415_v36 = vpop.eup %414 }
  0xf8   :  { %v103_v38 = vmul.f32 %v415_v36, %v86_v28 }
  0xfa   :  { %v104_v39 = vpack.c.bf16 %v103_v38, %v102_v37 }
  0xfc   :  { %385 = vmatmul.mubr.bf16.vlgmr.msra.gmra.mrb[0].mxu1 %v104_v39 }
 0x15d   :  { %v392_v40 = vpop.f32.mrb[4].mxu0 }
 0x15e   :  { %v311_v41 = vpop.f32.mrb[5].mxu0 }
 0x1cf   :  { %v210_v43 = vpop.f32.mrb[0].mxu1 }
 0x1d0   :  { %v211_v44 = vadd.f32 %v334_v42, %v210_v43  ;;  %v386_v45 = vpop.f32.mrb[1].mxu1 }
 0x1d1   :  { %v213_v46 = vpop.f32.mrb[2].mxu1 }
 0x1d2   :  { %v320_v47 = vsub.f32 %v211_v44, %v311_v41  ;;  %v214_v48 = vadd.f32 %v334_v42, %v213_v46  ;;  %v387_v49 = vpop.f32.mrb[3].mxu1 }
 0x1d4   :  { %323 = vst.msk [vmem:[%s509_s6] sm:$0xff] %vm322_vm8, %v320_v47  ;;  %v321_v50 = vsub.f32 %v214_v48, %v392_v40 }
 0x1d6   :  { %324 = vst.msk [vmem:[%s509_s6 + $0x8] sm:$0xff] %vm322_vm8, %v321_v50 }

</bundles_post_ra>
